<compile_context>
chip_gen: v7x
topology: tpu7x:2x2x1
jax: 0.10.0
libtpu: 0.0.40
codegen_flags: <defaults>
</compile_context>

<pallas_src>
import jax
import jax.numpy as jnp
from jax.experimental import pallas as pl
from jax.experimental.pallas import tpu as pltpu


def _round_up(x, m):
    return ((x + m - 1) // m) * m


def _actor_kernel(ma_ref, x_ref, w_ref, b_ref, o_ref):
    # Linear: z = x @ W + b  (MXU matmul, f32 accumulation)
    z = jnp.dot(x_ref[...], w_ref[...], preferred_element_type=jnp.float32)
    z = z + b_ref[...]                       # bias broadcast over the batch tile
    a = jnp.maximum(z, 0.0)                  # F.relu
    a = ma_ref[0, 0] * jnp.tanh(a)           # max_action * tanh(a)  (EUP tanh)
    o_ref[...] = a.astype(o_ref.dtype)


def actor_forward(state, weight, bias, max_action, *, batch_tile=512):
    """state: [B, S] f32, weight: [S, A] f32, bias: [A] f32 -> [B, A] f32."""
    B, S = state.shape
    S_w, A = weight.shape
    assert S_w == S and bias.shape == (A,)

    # Lane-dense output: pad the action dim to a multiple of 128.
    A_pad = _round_up(A, 128)
    # Batch tile: largest tile up to `batch_tile`, multiple of 8 (sublanes).
    # Batch is padded so every grid step sees a full tile (padding sliced off).
    TB = _round_up(min(batch_tile, _round_up(B, 8)), 8)
    B_pad = _round_up(B, TB)

    # Zero padding is semantically inert: padded weight columns / bias lanes and
    # padded batch rows are sliced away before returning.
    state_p = state if B_pad == B else jnp.pad(state, ((0, B_pad - B), (0, 0)))
    weight_p = weight if A_pad == A else jnp.pad(weight, ((0, 0), (0, A_pad - A)))
    bias_p = bias if A_pad == A else jnp.pad(bias, (0, A_pad - A))
    bias2d = bias_p.reshape(1, A_pad)
    ma = jnp.full((1, 1), max_action, dtype=jnp.float32)   # SMEM scalar, no recompile

    grid = (B_pad // TB,)

    out = pl.pallas_call(
        _actor_kernel,
        out_shape=jax.ShapeDtypeStruct((B_pad, A_pad), state.dtype),
        grid=grid,
        in_specs=[
            pl.BlockSpec(memory_space=pltpu.MemorySpace.SMEM),   # max_action (1,1)
            pl.BlockSpec((TB, S), lambda i: (i, 0)),             # state batch tile
            pl.BlockSpec((S, A_pad), lambda i: (0, 0)),          # weight: VMEM-resident
            pl.BlockSpec((1, A_pad), lambda i: (0, 0)),          # bias:   VMEM-resident
        ],
        out_specs=pl.BlockSpec((TB, A_pad), lambda i: (i, 0)),
        compiler_params=pltpu.CompilerParams(
            # Independent batch tiles -> shard grid across TensorCores on v7x.
            dimension_semantics=("parallel",),
        ),
        cost_estimate=pl.CostEstimate(
            flops=2 * B_pad * S * A_pad,
            transcendentals=B_pad * A_pad,
            bytes_accessed=4 * (B_pad * S + S * A_pad + A_pad + B_pad * A_pad),
        ),
    )(ma, state_p, weight_p, bias2d)

    return out[:B, :A]


def actor_reference(state, weight, bias, max_action):
    z = state @ weight + bias
    return max_action * jnp.tanh(jnp.maximum(z, 0.0))


if __name__ == "__main__":
    # Small shapes consistent with the module: Linear(state_dim, action_dim)
    batch, state_dim, action_dim = 2, 4, 8
    max_action = 2.0

    key = jax.random.PRNGKey(0)
    k_x, k_w, k_b, k_x2 = jax.random.split(key, 4)

    # PyTorch-Linear-style init: U(-1/sqrt(fan_in), 1/sqrt(fan_in))
    bound = 1.0 / jnp.sqrt(jnp.float32(state_dim))
    weight = jax.random.uniform(k_w, (state_dim, action_dim),
                                jnp.float32, -bound, bound)
    bias = jax.random.uniform(k_b, (action_dim,), jnp.float32, -bound, bound)
    state = jax.random.uniform(k_x, (batch, state_dim), jnp.float32)

    out = jax.block_until_ready(actor_forward(state, weight, bias, max_action))
    ref = actor_reference(state, weight, bias, max_action)
    assert out.shape == (batch, action_dim)
    assert jnp.allclose(out, ref, atol=1e-5, rtol=1e-5)

    # Exercise the batch-tiled / padded path (multi-step grid, ragged batch).
    state2 = jax.random.uniform(k_x2, (40, state_dim), jnp.float32)
    out2 = jax.block_until_ready(
        actor_forward(state2, weight, bias, max_action, batch_tile=16))
    ref2 = actor_reference(state2, weight, bias, max_action)
    assert out2.shape == (40, action_dim)
    assert jnp.allclose(out2, ref2, atol=1e-5, rtol=1e-5)

    print("KERNEL_OK")
</pallas_src>

<mosaic_0001>
module attributes {stable_mosaic.version = 11 : i64} {
  func.func @_actor_kernel(%arg0: i32, %arg1: memref<1x1xf32, #tpu.memory_space<smem>>, %arg2: memref<8x4xf32, #tpu.memory_space<vmem>>, %arg3: memref<4x128xf32, #tpu.memory_space<vmem>>, %arg4: memref<1x128xf32, #tpu.memory_space<vmem>>, %arg5: memref<8x128xf32, #tpu.memory_space<vmem>>) attributes {dimension_semantics = [#tpu.dimension_semantics<parallel>], iteration_bounds = array<i64: 1>, scalar_prefetch = 0 : i64, scratch_operands = 0 : i64, tpu.core_type = #tpu.core_type<tc>, window_params = [{transform_indices = @transform_0, window_bounds = array<i64: 1, 1>}, {transform_indices = @transform_1, window_bounds = array<i64: 8, 4>}, {pipeline_mode = #tpu.pipeline_mode<synchronous>, transform_indices = @transform_2, window_bounds = array<i64: 4, 128>}, {pipeline_mode = #tpu.pipeline_mode<synchronous>, transform_indices = @transform_3, window_bounds = array<i64: 1, 128>}, {transform_indices = @transform_4, window_bounds = array<i64: 8, 128>}]} {
    %c0 = arith.constant 0 : index
    %c0_0 = arith.constant 0 : index
    %0 = vector.load %arg2[%c0, %c0_0] : memref<8x4xf32, #tpu.memory_space<vmem>>, vector<8x4xf32>
    %c0_1 = arith.constant 0 : index
    %c0_2 = arith.constant 0 : index
    %1 = vector.load %arg3[%c0_1, %c0_2] : memref<4x128xf32, #tpu.memory_space<vmem>>, vector<4x128xf32>
    %cst = arith.constant dense<0.000000e+00> : vector<8x128xf32>
    %2 = tpu.matmul %0, %1, %cst {dimension_numbers = #tpu.dot_dimension_numbers<[1], [0], [0], [1], [0, 0, 1, 1], [], []>} : vector<8x4xf32>, vector<4x128xf32>, vector<8x128xf32> -> vector<8x128xf32>
    %c0_3 = arith.constant 0 : index
    %c0_4 = arith.constant 0 : index
    %3 = vector.load %arg4[%c0_3, %c0_4] : memref<1x128xf32, #tpu.memory_space<vmem>>, vector<1x128xf32>
    %4 = vector.broadcast %3 : vector<1x128xf32> to vector<8x128xf32>
    %5 = arith.addf %2, %4 : vector<8x128xf32>
    %cst_5 = arith.constant 0.000000e+00 : f32
    %6 = vector.broadcast %cst_5 : f32 to vector<8x128xf32>
    %7 = arith.maximumf %5, %6 : vector<8x128xf32>
    %c0_6 = arith.constant 0 : index
    %c0_7 = arith.constant 0 : index
    %8 = memref.load %arg1[%c0_6, %c0_7] : memref<1x1xf32, #tpu.memory_space<smem>>
    %9 = math.tanh %7 : vector<8x128xf32>
    %10 = vector.broadcast %8 : f32 to vector<8x128xf32>
    %11 = arith.mulf %10, %9 : vector<8x128xf32>
    %c0_8 = arith.constant 0 : index
    %c0_9 = arith.constant 0 : index
    %12 = vector.load %arg5[%c0_8, %c0_9] : memref<8x128xf32, #tpu.memory_space<vmem>>, vector<8x128xf32>
    tpu.vector_store %arg5[%c0_8, %c0_9], %11 {strides = array<i32>} : memref<8x128xf32, #tpu.memory_space<vmem>>, vector<8x128xf32>,
    return
  }
  func.func @transform_0(%arg0: i32) -> (i32, i32) {
    %c0_i32 = arith.constant 0 : i32
    %c0_i32_0 = arith.constant 0 : i32
    %c0_i32_1 = arith.constant 0 : i32
    return %c0_i32, %c0_i32_0 : i32, i32
  }
  func.func @transform_1(%arg0: i32) -> (i32, i32) {
    %c0_i32 = arith.constant 0 : i32
    %c0_i32_0 = arith.constant 0 : i32
    return %arg0, %c0_i32 : i32, i32
  }
  func.func @transform_2(%arg0: i32) -> (i32, i32) {
    %c0_i32 = arith.constant 0 : i32
    %c0_i32_0 = arith.constant 0 : i32
    %c0_i32_1 = arith.constant 0 : i32
    return %c0_i32, %c0_i32_0 : i32, i32
  }
  func.func @transform_3(%arg0: i32) -> (i32, i32) {
    %c0_i32 = arith.constant 0 : i32
    %c0_i32_0 = arith.constant 0 : i32
    %c0_i32_1 = arith.constant 0 : i32
    return %c0_i32, %c0_i32_0 : i32, i32
  }
  func.func @transform_4(%arg0: i32) -> (i32, i32) {
    %c0_i32 = arith.constant 0 : i32
    %c0_i32_0 = arith.constant 0 : i32
    return %arg0, %c0_i32 : i32, i32
  }
}

</mosaic_0001>

<bundles_post_ra>
// kernel: tpu_custom_call.1
= control target key start
LH: loop header
LB: loop body
LE: loop exit
PB: predicated region body
PF: predicated region fallthrough
CT: control target
= control target key end

     0   :  { %vm32_vm0 = vcmask 1043456   ;;  %v165_v2 = vmov 0.0   ;;  %vm166_vm1 = vmmov 0   ;;  %vm28_vm2 = vcmask 31744   ;;  %s217_s0 = inlined_call_operand.<no memory space> [shape: f32[1,1], index: 0, kind: input, shape index: {}]   ;;  %s218_s1 = inlined_call_operand.vmem [shape: f32[8,4], index: 1, kind: input, shape index: {}]   ;;  %s219_s2 = inlined_call_operand.vmem [shape: f32[4,128], index: 2, kind: input, shape index: {}]   ;;  %s220_s3 = inlined_call_operand.vmem [shape: f32[1,128], index: 3, kind: input, shape index: {}]   ;;  %s221_s4 = inlined_call_operand.hbm [shape: f32[8,128], index: 4, kind: output, shape index: {}]  }
   0x1   :  { %v20_v0 = vld [vmem:[%s219_s2] sm:$0xf]  ;;  %131 = vmatprep.subr.mxu0 %v165_v2  ;;  %133 = vmatprep.mubr.msk.f32.mxu0 %vm166_vm1, %v165_v2 }
   0x2   :  { %v19_v1 = vld [vmem:[%s218_s1] sm:$0xff] }
   0x3   :  { %10 = vsyncpa [#allocation4], 0  ;;  %132 = vmatpush3.msk.msra.mxu0 %vm32_vm0, %v20_v0  ;;  %v126_v3 = vld [vmem:[%s220_s3] ss:$0 sm:$0xff]  ;;  %v109_v8 = vstv %s217_s0  ;;  %s167_s1 = smov [#allocation3]  }
   0x4   :  { %134 = vmatmul.mubr.msk.f32.vlgmr.msra.gmra.mrb[0].mxu0 %vm28_vm2, %v19_v1  ;;  %s118_s22 = sshll.u32 %s167_s1, 4  ;;  %s119_s22 = int_to_ptr.vmem [resolvable:$true] %s118_s22 }
   0x5   :  { %s141_s23 = scalar_lea.vmem %s119_s22, 128  ;;  %p146_p1 = scmp.lt.s32.totalorder %s119_s22, %s119_s22 }
   0x6   :  { %p142_p0 = scmp.ne.s32.totalorder %s119_s22, %s141_s23  ;;  %p147_p2 = scmp.lt.s32.totalorder %s141_s23, %s141_s23 }
   0x8   :  { %p148_p3 = por %p147_p2, %p146_p1 }
   0xa   :  { %p149_p4 = pnand %p148_p3, %p142_p0 }
  0xd7   :  { %v102_v4 = vpop.f32.mrb[0].mxu0 }
  0xd8   :  { %v103_v5 = vadd.f32 %v126_v3, %v102_v4  ;;  %v135_v6 = vpop.f32.mrb[1].mxu0 }
  0xda   :  { %v106_v7 = vmax.f32 %v103_v5, 0.0 }
  0xdc   :  { %139 = vtanh.f32 %v106_v7 }
  0xe6   :  { %v140_v9 = vpop.eup %139 }
  0xe7   :  { %v110_v10 = vmul.f32 %v140_v9, %v109_v8 }
  0xe9   :  { %111 = vst [vmem:[#allocation3] sm:$0xff] %v110_v10 }
  0xea   :  { %152 = shalt.err (!%p149_p4)
}
  0xeb   :  { %s153_s25 = scalar_lea.hbm %s221_s4, 128 }
  0xec   :  { %p154_p5 = scmp.ne.s32.totalorder %s221_s4, %s153_s25  ;;  %p157_p6 = scmp.lt.u32.totalorder %s153_s25, %s221_s4 }
  0xee   :  { %p159_p7 = pnand %p157_p6, %p154_p5 }
  0xf0   :  { %162 = shalt.err (!%p159_p7)
}
  0xf1   :  { %121 = dma.vmem_to_hbm [thread:$0]  %s119_s22, 128, %s221_s4, [#allocation4]  }
  0xf2   :  { %163 = dma.done.wait [#allocation4], 128  }
  0xf3   :  { %164 = vsyncadd [#allocation4], 4294967168 }
  0xf4   :  { %125 = vsyncpa [#allocation4], 1 }

</bundles_post_ra>
